<compile_context>
chip_gen: v7x
topology: tpu7x:2x2x1
jax: 0.10.0
libtpu: 0.0.40
codegen_flags: <defaults>
</compile_context>

<pallas_src>
import jax
import jax.numpy as jnp
from jax.experimental import pallas as pl
from jax.experimental.pallas import tpu as pltpu


def _round_up(x, m):
    return ((x + m - 1) // m) * m


def _make_kernel(D, TB, TD, mask_needed):
    n_chunks = TD // 128

    def kernel(h1_ref, h2_ref, out_ref, acc1_ref, acc2_ref):
        k = pl.program_id(1)

        @pl.when(k == 0)
        def _():
            acc1_ref[...] = jnp.zeros_like(acc1_ref)
            acc2_ref[...] = jnp.zeros_like(acc2_ref)

        col0 = k * TD
        lane_iota = (
            jax.lax.broadcasted_iota(jnp.int32, (TB, 128), 1)
            if mask_needed else None
        )

        def accumulate(h_ref, acc_ref):
            partial = None
            for c in range(n_chunks):
                # f32 before squaring (exact squares, also required on v5e).
                h = h_ref[:, c * 128:(c + 1) * 128].astype(jnp.float32)
                if mask_needed:
                    valid = (col0 + c * 128 + lane_iota) < D
                    h = jnp.where(valid, h, 0.0)
                sq = h * h
                partial = sq if partial is None else partial + sq
            # One accumulator read-modify-write per grid step (lane-dense).
            acc_ref[...] += partial

        accumulate(h1_ref, acc1_ref)
        accumulate(h2_ref, acc2_ref)

        @pl.when(k == pl.num_programs(1) - 1)
        def _():
            ssq1 = jnp.sum(acc1_ref[...], axis=-1, keepdims=True)
            ssq2 = jnp.sum(acc2_ref[...], axis=-1, keepdims=True)
            n1 = jnp.sqrt(ssq1)
            n2 = jnp.sqrt(ssq2)
            out_ref[...] = jnp.exp(-jnp.abs(n1 - n2)).astype(out_ref.dtype)

    return kernel


def classifier_forward(hidden_1, hidden_2):
    assert hidden_1.shape == hidden_2.shape
    assert hidden_1.dtype == hidden_2.dtype
    B, D = hidden_1.shape
    itemsize = jnp.dtype(hidden_1.dtype).itemsize

    LANE = 128
    sublane = max(8, 32 // itemsize)  # 8 for f32, 16 for bf16

    # Generation-aware VMEM capacity (v5e/v6e: 128 MiB, v7x: 64 MiB).
    try:
        vmem_cap = int(getattr(pltpu.get_tpu_info(), "vmem_capacity_bytes",
                               64 << 20))
    except Exception:
        vmem_cap = 64 << 20

    # ---- TD: 128-multiple near evenly splitting round_up(D, 128) ----
    TD_MAX = 2048
    n_lanes = pl.cdiv(D, LANE)
    kd = pl.cdiv(n_lanes, TD_MAX // LANE)
    TD = pl.cdiv(n_lanes, kd) * LANE

    # ---- TB: sized from a VMEM-derived per-input tile target ----
    target_tile_bytes = min(8 << 20, vmem_cap // 10)
    B8 = _round_up(B, sublane)
    tb = target_tile_bytes // (TD * itemsize)
    tb = max(sublane, (tb // sublane) * sublane)
    TB = min(tb, 4096, B8)
    if B8 >= 2 * sublane:
        # Guarantee >= 2 batch grid iterations so both v7x TCs get work.
        TB = min(TB, _round_up((B8 + 1) // 2, sublane))

    grid = (pl.cdiv(B, TB), pl.cdiv(D, TD))
    mask_needed = (D % TD) != 0

    # VMEM budget: 2 inputs x 2 pipeline buffers + accumulators/temps + output.
    est = (4 * TB * TD * itemsize
           + 4 * TB * 128 * 4
           + 4 * TB * 4)
    vmem_limit = int(min(int(vmem_cap * 0.58), max(32 << 20, 2 * est)))

    cost = pl.CostEstimate(
        flops=4 * B * D,              # mul + add per element, two inputs
        transcendentals=3 * B,        # 2 sqrt + 1 exp per row
        bytes_accessed=2 * B * D * itemsize + B * 4,
    )

    kernel = _make_kernel(D, TB, TD, mask_needed)

    return pl.pallas_call(
        kernel,
        out_shape=jax.ShapeDtypeStruct((B, 1), jnp.float32),
        grid_spec=pltpu.PrefetchScalarGridSpec(
            num_scalar_prefetch=0,
            grid=grid,
            in_specs=[
                pl.BlockSpec((TB, TD), lambda i, k: (i, k)),
                pl.BlockSpec((TB, TD), lambda i, k: (i, k)),
            ],
            out_specs=pl.BlockSpec((TB, 1), lambda i, k: (i, 0)),
            scratch_shapes=[
                pltpu.VMEM((TB, 128), jnp.float32),
                pltpu.VMEM((TB, 128), jnp.float32),
            ],
        ),
        compiler_params=pltpu.CompilerParams(
            dimension_semantics=("parallel", "arbitrary"),
            vmem_limit_bytes=vmem_limit,
        ),
        cost_estimate=cost,
    )(hidden_1, hidden_2)


def classifier_reference(hidden_1, hidden_2):
    n1 = jnp.linalg.norm(hidden_1.astype(jnp.float32), ord=2, axis=1, keepdims=True)
    n2 = jnp.linalg.norm(hidden_2.astype(jnp.float32), ord=2, axis=1, keepdims=True)
    return jnp.exp(-jnp.abs(n1 - n2))


if __name__ == "__main__":
    key = jax.random.PRNGKey(0)

    # Case 1: small, non-tile-aligned (exercises lane masking + partial rows).
    k1, k2, k3, k4 = jax.random.split(key, 4)
    B, D = 6, 200
    h1 = jax.random.normal(k1, (B, D), dtype=jnp.float32)
    h2 = jax.random.normal(k2, (B, D), dtype=jnp.float32)
    out = jax.block_until_ready(classifier_forward(h1, h2))
    ref = classifier_reference(h1, h2)
    assert out.shape == (B, 1), out.shape
    assert jnp.allclose(out, ref, atol=1e-5, rtol=1e-5), (out, ref)

    # Case 2: multi-step grid on both axes (batch split + K reduction + mask).
    B2, D2 = 133, 2500
    g1 = jax.random.normal(k3, (B2, D2), dtype=jnp.float32)
    g2 = jax.random.normal(k4, (B2, D2), dtype=jnp.float32)
    out2 = jax.block_until_ready(classifier_forward(g1, g2))
    ref2 = classifier_reference(g1, g2)
    assert out2.shape == (B2, 1), out2.shape
    assert jnp.allclose(out2, ref2, atol=1e-4, rtol=1e-4), (out2, ref2)

    print("KERNEL_OK")
</pallas_src>

<mosaic_0001>
module attributes {stable_mosaic.version = 11 : i64} {
  func.func @kernel(%arg0: i32, %arg1: i32, %arg2: memref<8x256xf32, #tpu.memory_space<vmem>>, %arg3: memref<8x256xf32, #tpu.memory_space<vmem>>, %arg4: memref<8x1xf32, #tpu.memory_space<vmem>>, %arg5: memref<8x128xf32, #tpu.memory_space<vmem>>, %arg6: memref<8x128xf32, #tpu.memory_space<vmem>>) attributes {dimension_semantics = [#tpu.dimension_semantics<parallel>, #tpu.dimension_semantics<arbitrary>], iteration_bounds = array<i64: 1, 1>, scalar_prefetch = 0 : i64, scratch_operands = 2 : i64, tpu.core_type = #tpu.core_type<tc>, window_params = [{transform_indices = @transform_0, window_bounds = array<i64: 8, 256>}, {transform_indices = @transform_1, window_bounds = array<i64: 8, 256>}, {transform_indices = @transform_2, window_bounds = array<i64: 8, 1>}]} {
    %c0_i32 = arith.constant 0 : i32
    %0 = arith.cmpi eq, %arg1, %c0_i32 : i32
    %1 = arith.extui %0 : i1 to i32
    %c0_i32_0 = arith.constant 0 : i32
    %2 = arith.cmpi ne, %1, %c0_i32_0 : i32
    scf.if %2 {
      %cst_26 = arith.constant 0.000000e+00 : f32
      %52 = vector.broadcast %cst_26 : f32 to vector<8x128xf32>
      %c0_27 = arith.constant 0 : index
      %c0_28 = arith.constant 0 : index
      %53 = vector.load %arg5[%c0_27, %c0_28] : memref<8x128xf32, #tpu.memory_space<vmem>>, vector<8x128xf32>
      tpu.vector_store %arg5[%c0_27, %c0_28], %52 {strides = array<i32>} : memref<8x128xf32, #tpu.memory_space<vmem>>, vector<8x128xf32>,
      %cst_29 = arith.constant 0.000000e+00 : f32
      %54 = vector.broadcast %cst_29 : f32 to vector<8x128xf32>
      %c0_30 = arith.constant 0 : index
      %c0_31 = arith.constant 0 : index
      %55 = vector.load %arg6[%c0_30, %c0_31] : memref<8x128xf32, #tpu.memory_space<vmem>>, vector<8x128xf32>
      tpu.vector_store %arg6[%c0_30, %c0_31], %54 {strides = array<i32>} : memref<8x128xf32, #tpu.memory_space<vmem>>, vector<8x128xf32>,
    } else {
    }
    %c256_i32 = arith.constant 256 : i32
    %3 = arith.muli %arg1, %c256_i32 : i32
    %4 = tpu.iota {dimensions = array<i32: 1>} : vector<8x128xi32>
    %c0 = arith.constant 0 : index
    %c0_1 = arith.constant 0 : index
    %5 = vector.load %arg2[%c0, %c0_1] : memref<8x256xf32, #tpu.memory_space<vmem>>, vector<8x128xf32>
    %c0_i32_2 = arith.constant 0 : i32
    %6 = arith.addi %3, %c0_i32_2 : i32
    %7 = vector.broadcast %6 : i32 to vector<8x128xi32>
    %8 = arith.addi %7, %4 : vector<8x128xi32>
    %c200_i32 = arith.constant 200 : i32
    %9 = vector.broadcast %c200_i32 : i32 to vector<8x128xi32>
    %10 = arith.cmpi slt, %8, %9 : vector<8x128xi32>
    %cst = arith.constant 0.000000e+00 : f32
    %11 = vector.broadcast %cst : f32 to vector<8x128xf32>
    %12 = arith.select %10, %5, %11 : vector<8x128xi1>, vector<8x128xf32>
    %13 = arith.mulf %12, %12 : vector<8x128xf32>
    %c0_3 = arith.constant 0 : index
    %c128 = arith.constant 128 : index
    %14 = vector.load %arg2[%c0_3, %c128] : memref<8x256xf32, #tpu.memory_space<vmem>>, vector<8x128xf32>
    %c128_i32 = arith.constant 128 : i32
    %15 = arith.addi %3, %c128_i32 : i32
    %16 = vector.broadcast %15 : i32 to vector<8x128xi32>
    %17 = arith.addi %16, %4 : vector<8x128xi32>
    %c200_i32_4 = arith.constant 200 : i32
    %18 = vector.broadcast %c200_i32_4 : i32 to vector<8x128xi32>
    %19 = arith.cmpi slt, %17, %18 : vector<8x128xi32>
    %cst_5 = arith.constant 0.000000e+00 : f32
    %20 = vector.broadcast %cst_5 : f32 to vector<8x128xf32>
    %21 = arith.select %19, %14, %20 : vector<8x128xi1>, vector<8x128xf32>
    %22 = arith.mulf %21, %21 : vector<8x128xf32>
    %23 = arith.addf %13, %22 : vector<8x128xf32>
    %c0_6 = arith.constant 0 : index
    %c0_7 = arith.constant 0 : index
    %24 = vector.load %arg5[%c0_6, %c0_7] : memref<8x128xf32, #tpu.memory_space<vmem>>, vector<8x128xf32>
    %25 = arith.addf %24, %23 : vector<8x128xf32>
    %c0_8 = arith.constant 0 : index
    %c0_9 = arith.constant 0 : index
    %26 = vector.load %arg5[%c0_8, %c0_9] : memref<8x128xf32, #tpu.memory_space<vmem>>, vector<8x128xf32>
    tpu.vector_store %arg5[%c0_8, %c0_9], %25 {strides = array<i32>} : memref<8x128xf32, #tpu.memory_space<vmem>>, vector<8x128xf32>,
    %c0_10 = arith.constant 0 : index
    %c0_11 = arith.constant 0 : index
    %27 = vector.load %arg3[%c0_10, %c0_11] : memref<8x256xf32, #tpu.memory_space<vmem>>, vector<8x128xf32>
    %c0_i32_12 = arith.constant 0 : i32
    %28 = arith.addi %3, %c0_i32_12 : i32
    %29 = vector.broadcast %28 : i32 to vector<8x128xi32>
    %30 = arith.addi %29, %4 : vector<8x128xi32>
    %c200_i32_13 = arith.constant 200 : i32
    %31 = vector.broadcast %c200_i32_13 : i32 to vector<8x128xi32>
    %32 = arith.cmpi slt, %30, %31 : vector<8x128xi32>
    %cst_14 = arith.constant 0.000000e+00 : f32
    %33 = vector.broadcast %cst_14 : f32 to vector<8x128xf32>
    %34 = arith.select %32, %27, %33 : vector<8x128xi1>, vector<8x128xf32>
    %35 = arith.mulf %34, %34 : vector<8x128xf32>
    %c0_15 = arith.constant 0 : index
    %c128_16 = arith.constant 128 : index
    %36 = vector.load %arg3[%c0_15, %c128_16] : memref<8x256xf32, #tpu.memory_space<vmem>>, vector<8x128xf32>
    %c128_i32_17 = arith.constant 128 : i32
    %37 = arith.addi %3, %c128_i32_17 : i32
    %38 = vector.broadcast %37 : i32 to vector<8x128xi32>
    %39 = arith.addi %38, %4 : vector<8x128xi32>
    %c200_i32_18 = arith.constant 200 : i32
    %40 = vector.broadcast %c200_i32_18 : i32 to vector<8x128xi32>
    %41 = arith.cmpi slt, %39, %40 : vector<8x128xi32>
    %cst_19 = arith.constant 0.000000e+00 : f32
    %42 = vector.broadcast %cst_19 : f32 to vector<8x128xf32>
    %43 = arith.select %41, %36, %42 : vector<8x128xi1>, vector<8x128xf32>
    %44 = arith.mulf %43, %43 : vector<8x128xf32>
    %45 = arith.addf %35, %44 : vector<8x128xf32>
    %c0_20 = arith.constant 0 : index
    %c0_21 = arith.constant 0 : index
    %46 = vector.load %arg6[%c0_20, %c0_21] : memref<8x128xf32, #tpu.memory_space<vmem>>, vector<8x128xf32>
    %47 = arith.addf %46, %45 : vector<8x128xf32>
    %c0_22 = arith.constant 0 : index
    %c0_23 = arith.constant 0 : index
    %48 = vector.load %arg6[%c0_22, %c0_23] : memref<8x128xf32, #tpu.memory_space<vmem>>, vector<8x128xf32>
    tpu.vector_store %arg6[%c0_22, %c0_23], %47 {strides = array<i32>} : memref<8x128xf32, #tpu.memory_space<vmem>>, vector<8x128xf32>,
    %c0_i32_24 = arith.constant 0 : i32
    %49 = arith.cmpi eq, %arg1, %c0_i32_24 : i32
    %50 = arith.extui %49 : i1 to i32
    %c0_i32_25 = arith.constant 0 : i32
    %51 = arith.cmpi ne, %50, %c0_i32_25 : i32
    scf.if %51 {
      %c0_26 = arith.constant 0 : index
      %c0_27 = arith.constant 0 : index
      %52 = vector.load %arg5[%c0_26, %c0_27] : memref<8x128xf32, #tpu.memory_space<vmem>>, vector<8x128xf32>
      %cst_28 = arith.constant dense<0.000000e+00> : vector<8xf32>
      %53 = vector.multi_reduction <add>, %52, %cst_28 [1] : vector<8x128xf32> to vector<8xf32>
      %54 = vector.shape_cast %53 : vector<8xf32> to vector<8x1xf32>
      %c0_29 = arith.constant 0 : index
      %c0_30 = arith.constant 0 : index
      %55 = vector.load %arg6[%c0_29, %c0_30] : memref<8x128xf32, #tpu.memory_space<vmem>>, vector<8x128xf32>
      %cst_31 = arith.constant dense<0.000000e+00> : vector<8xf32>
      %56 = vector.multi_reduction <add>, %55, %cst_31 [1] : vector<8x128xf32> to vector<8xf32>
      %57 = vector.shape_cast %56 : vector<8xf32> to vector<8x1xf32>
      %58 = math.sqrt %54 : vector<8x1xf32>
      %59 = math.sqrt %57 : vector<8x1xf32>
      %60 = arith.subf %58, %59 : vector<8x1xf32>
      %61 = math.absf %60 : vector<8x1xf32>
      %cst_32 = arith.constant 0.000000e+00 : f32
      %62 = vector.broadcast %cst_32 : f32 to vector<8x1xf32>
      %63 = arith.subf %62, %61 : vector<8x1xf32>
      %64 = math.exp %63 : vector<8x1xf32>
      %c0_33 = arith.constant 0 : index
      %c0_34 = arith.constant 0 : index
      %65 = vector.load %arg4[%c0_33, %c0_34] : memref<8x1xf32, #tpu.memory_space<vmem>>, vector<8x1xf32>
      tpu.vector_store %arg4[%c0_33, %c0_34], %64 {strides = array<i32>} : memref<8x1xf32, #tpu.memory_space<vmem>>, vector<8x1xf32>,
    } else {
    }
    return
  }
  func.func @transform_0(%arg0: i32, %arg1: i32) -> (i32, i32) {
    %c0_i32 = arith.constant 0 : i32
    return %arg0, %arg1 : i32, i32
  }
  func.func @transform_1(%arg0: i32, %arg1: i32) -> (i32, i32) {
    %c0_i32 = arith.constant 0 : i32
    return %arg0, %arg1 : i32, i32
  }
  func.func @transform_2(%arg0: i32, %arg1: i32) -> (i32, i32) {
    %c0_i32 = arith.constant 0 : i32
    %c0_i32_0 = arith.constant 0 : i32
    return %arg0, %c0_i32 : i32, i32
  }
}

</mosaic_0001>

<bundles_post_ra>
// kernel: tpu_custom_call.1
= control target key start
LH: loop header
LB: loop body
LE: loop exit
PB: predicated region body
PF: predicated region fallthrough
CT: control target
= control target key end

     0   :  { %7 = vsyncpa [#allocation5], 0  ;;  %s207_s0 = inlined_call_operand.hbm [shape: f32[6,200], index: 0, kind: input, shape index: {}]   ;;  %s208_s1 = inlined_call_operand.hbm [shape: f32[6,200], index: 1, kind: input, shape index: {}]   ;;  %s209_s2 = inlined_call_operand.vmem [shape: f32[6,1], index: 2, kind: output, shape index: {}]  }
   0x1   :  { %8 = vsyncpa [#allocation7], 0  ;;  %s163_s9 = smov [#allocation4]   ;;  %s164_s11 = smov [#allocation6]  }
   0x2   :  { %s15_s10 = sshll.u32 %s163_s9, 4  ;;  %s25_s12 = sshll.u32 %s164_s11, 4  ;;  %s16_s10 = int_to_ptr.vmem [resolvable:$true] %s15_s10  ;;  %s26_s12 = int_to_ptr.vmem [resolvable:$true] %s25_s12 }
   0x3   :  { %s115_s15 = scalar_lea.hbm %s207_s0, 256 }
   0x4   :  { %p116_p0 = scmp.ne.s32.totalorder %s207_s0, %s115_s15  ;;  %p119_p1 = scmp.lt.u32.totalorder %s115_s15, %s207_s0 }
   0x6   :  { %p121_p2 = pnand %p119_p1, %p116_p0 }
   0x8   :  { %124 = shalt.err (!%p121_p2)
}
   0x9   :  { %s125_s20 = scalar_lea.vmem %s16_s10, 256  ;;  %p130_p4 = scmp.lt.s32.totalorder %s16_s10, %s16_s10 }
   0xa   :  { %p126_p3 = scmp.ne.s32.totalorder %s16_s10, %s125_s20  ;;  %p131_p5 = scmp.lt.s32.totalorder %s125_s20, %s125_s20 }
   0xc   :  { %p132_p6 = por %p131_p5, %p130_p4 }
   0xe   :  { %p133_p7 = pnand %p132_p6, %p126_p3 }
  0x10   :  { %136 = shalt.err (!%p133_p7)
}
  0x11   :  { %18 = dma.hbm_to_vmem [thread:$0]  %s207_s0, 256, %s16_s10, [#allocation5]  }
  0x12   :  { %s137_s25 = scalar_lea.hbm %s208_s1, 256 }
  0x13   :  { %p138_p8 = scmp.ne.s32.totalorder %s208_s1, %s137_s25  ;;  %p141_p9 = scmp.lt.u32.totalorder %s137_s25, %s208_s1 }
  0x15   :  { %p143_p10 = pnand %p141_p9, %p138_p8 }
  0x17   :  { %146 = shalt.err (!%p143_p10)
}
  0x18   :  { %s147_s30 = scalar_lea.vmem %s26_s12, 256  ;;  %p152_p12 = scmp.lt.s32.totalorder %s26_s12, %s26_s12 }
  0x19   :  { %p148_p11 = scmp.ne.s32.totalorder %s26_s12, %s147_s30  ;;  %p153_p13 = scmp.lt.s32.totalorder %s147_s30, %s147_s30 }
  0x1b   :  { %p154_p0 = por %p153_p13, %p152_p12 }
  0x1d   :  { %p155_p1 = pnand %p154_p0, %p148_p11 }
  0x1f   :  { %158 = shalt.err (!%p155_p1)
}
  0x20   :  { %28 = dma.hbm_to_vmem [thread:$0]  %s208_s1, 256, %s26_s12, [#allocation7]  }
  0x21   :  { %159 = dma.done.wait [#allocation5], 256  }
  0x22   :  { %160 = vsyncadd [#allocation5], 4294967040 }
  0x23   :  { %161 = dma.done.wait [#allocation7], 256  }
  0x24   :  { %162 = vsyncadd [#allocation7], 4294967040  ;;  %v42_v0 = vlaneseq  ;;  %v44_v3 = vld [vmem:[#allocation4] sm:$0xff]  ;;  %v50_v4 = vld [vmem:[#allocation4 + $0x8] sm:$0xff]  ;;  %vm99_vm5 = vcmask 7168  }
  0x25   :  { %v61_v5 = vld [vmem:[#allocation6] sm:$0xff]  ;;  %v49_v6 = vmul.f32 %v44_v3, %v44_v3  ;;  %v64_v8 = vld [vmem:[#allocation6 + $0x8] sm:$0xff] }
  0x26   :  { %v43_v1 = vand.u32 127, %v42_v0  ;;  %v63_v10 = vmul.f32 %v61_v5, %v61_v5 }
  0x28   :  { %v53_v2 = vadd.s32 128, %v43_v1 }
  0x2a   :  { %vm54_vm0 = vcmp.lt.s32.totalorder %v53_v2, 200 }
  0x2b   :  { %v55_v7 = vsel %vm54_vm0, %v50_v4, 0.0  ;;  %v65_v11 = vsel %vm54_vm0, %v64_v8, 0.0 }
  0x2c   :  { %v56_v9 = vmul.f32 %v55_v7, %v55_v7  ;;  %v66_v12 = vmul.f32 %v65_v11, %v65_v11 }
  0x2e   :  { %v57_v13 = vadd.f32 %v56_v9, %v49_v6  ;;  %v67_v14 = vadd.f32 %v66_v12, %v63_v10 }
  0x30   :  { %75 = vadd.xlane.f32.xlu0 %v57_v13 }
  0x34   :  { %78 = vadd.xlane.f32.xlu0 %v67_v14 }
  0xbd   :  { %v76_v15 = vpop.xlane.xlu0 %75 }
  0xbe   :  { %109 = vrsqrt.f32 %v76_v15  ;;  %vm82_vm1 = vcmp.eq.f32.partialorder %v76_v15, inf  ;;  %v85_v22 = vand.u32 2147483648, %v76_v15  ;;  %vm84_vm3 = vcmp.eq.f32.partialorder %v76_v15, 0.0 }
  0xc1   :  { %v79_v16 = vpop.xlane.xlu0 %78 }
  0xc2   :  { %111 = vrsqrt.f32 %v79_v16  ;;  %vm89_vm2 = vcmp.eq.f32.partialorder %v79_v16, inf  ;;  %v92_v23 = vand.u32 2147483648, %v79_v16  ;;  %vm91_vm4 = vcmp.eq.f32.partialorder %v79_v16, 0.0 }
  0xc8   :  { %v110_v17 = vpop.eup %109 }
  0xc9   :  { %v81_v18 = vmul.f32 %v110_v17, %v76_v15 }
  0xcb   :  { %v83_v20 = vsel %vm82_vm1, %v76_v15, %v81_v18 }
  0xcc   :  { %v112_v19 = vpop.eup %111  ;;  %v86_v25 = vsel %vm84_vm3, %v85_v22, %v83_v20 }
  0xcd   :  { %v88_v21 = vmul.f32 %v112_v19, %v79_v16 }
  0xcf   :  { %v90_v24 = vsel %vm89_vm2, %v79_v16, %v88_v21 }
  0xd0   :  { %v93_v26 = vsel %vm91_vm4, %v92_v23, %v90_v24 }
  0xd1   :  { %v94_v27 = vsub.f32 %v86_v25, %v93_v26 }
  0xd3   :  { %v95_v28 = vand.u32 2147483647, %v94_v27 }
  0xd5   :  { %v96_v29 = vsub.f32 0.0, %v95_v28 }
  0xd7   :  { %v97_v30 = vmul.f32 1.442695, %v96_v29 }
  0xd9   :  { %113 = vpow2.f32 %v97_v30 }
  0xe3   :  { %v114_v31 = vpop.eup %113 }
  0xe4   :  { %100 = vst.msk [vmem:[%s209_s2] sm:$0xff] %vm99_vm5, %v114_v31 }
  0xe5   :  { %105 = vsyncpa [#allocation5], 1 }
  0xe6   :  { %106 = vsyncpa [#allocation7], 1 }

</bundles_post_ra>
